<compile_context>
chip_gen: v6e
topology: v6e:2x2x1
jax: 0.10.0
libtpu: 0.0.40
codegen_flags: <defaults>
</compile_context>

<pallas_src>
import functools

import jax
import jax.numpy as jnp
from jax.experimental import pallas as pl
from jax.experimental.pallas import tpu as pltpu

NUM_WIDE = 13   # wide features (Linear(13, E))
NUM_CAT = 7     # Embedding(7, H)
NUM_IN = NUM_WIDE + 1


# ---------------------------------------------------------------------------
# Fused MetarBlock kernel: one grid step = one batch tile, whole forward pass.
# ---------------------------------------------------------------------------
def _metar_kernel(x_ref, ww_ref, bw_ref, emb_ref, w1_ref, b1_ref, w2_ref, b2_ref,
                  o_ref):
    x = x_ref[...]                                   # (tb, 14)
    tb = x.shape[0]

    # ---- wide path: Linear(13, E) on the first 13 columns -----------------
    wide = jnp.dot(x[:, :NUM_WIDE], ww_ref[...],
                   preferred_element_type=jnp.float32) + bw_ref[...]

    # ---- deep path ---------------------------------------------------------
    # categorical index = last column, truncated toward zero like torch .int()
    cat = x[:, NUM_WIDE:NUM_WIDE + 1].astype(jnp.int32)          # (tb, 1)
    onehot = (jax.lax.broadcasted_iota(jnp.int32, (tb, NUM_CAT), 1)
              == cat).astype(jnp.float32)                         # (tb, 7)
    cat_emb = jnp.dot(onehot, emb_ref[...],
                      preferred_element_type=jnp.float32)         # (tb, H)

    h = jnp.dot(cat_emb, w1_ref[...],
                preferred_element_type=jnp.float32) + b1_ref[...]
    h = h * jax.nn.sigmoid(h)                                     # swish / SiLU
    deep = jnp.dot(h, w2_ref[...],
                   preferred_element_type=jnp.float32) + b2_ref[...]

    # ---- combine -----------------------------------------------------------
    o_ref[...] = wide + deep


def metar_block_forward(params, x, *, max_block_b=512):
    """params: dict of (already transposed) weights; x: (B, 14) f32.
    Returns (B, embedding_dim) f32."""
    B = x.shape[0]
    E = params["w_wide"].shape[1]
    H = params["emb"].shape[1]
    x = x.astype(jnp.float32)

    # Batch tiling: small batches -> single block (block == full dims is always
    # layout-legal); large batches -> 8-aligned tiles split "parallel" over cores.
    if B <= max_block_b:
        tb, Bp = B, B
        xp = x
    else:
        tb = max_block_b                       # multiple of 8
        Bp = pl.cdiv(B, tb) * tb
        xp = jnp.pad(x, ((0, Bp - B), (0, 0)))  # padded rows: cat=0 (valid), sliced off

    grid = (Bp // tb,)

    flops = 2 * Bp * (NUM_WIDE * E + NUM_CAT * H + H * E + E * E)
    transcendentals = Bp * E                   # one exp per sigmoid element
    bytes_accessed = 4 * (Bp * NUM_IN + NUM_WIDE * E + NUM_CAT * H + H * E
                          + E * E + 3 * E + Bp * E)

    out = pl.pallas_call(
        _metar_kernel,
        out_shape=jax.ShapeDtypeStruct((Bp, E), jnp.float32),
        grid=grid,
        in_specs=[
            pl.BlockSpec((tb, NUM_IN), lambda i: (i, 0)),        # x
            pl.BlockSpec((NUM_WIDE, E), lambda i: (0, 0)),       # wide_fc weight
            pl.BlockSpec((1, E), lambda i: (0, 0)),              # wide_fc bias
            pl.BlockSpec((NUM_CAT, H), lambda i: (0, 0)),        # embedding table
            pl.BlockSpec((H, E), lambda i: (0, 0)),              # deep_fc1 weight
            pl.BlockSpec((1, E), lambda i: (0, 0)),              # deep_fc1 bias
            pl.BlockSpec((E, E), lambda i: (0, 0)),              # deep_fc2 weight
            pl.BlockSpec((1, E), lambda i: (0, 0)),              # deep_fc2 bias
        ],
        out_specs=pl.BlockSpec((tb, E), lambda i: (i, 0)),
        compiler_params=pltpu.CompilerParams(
            dimension_semantics=("parallel",)),
        cost_estimate=pl.CostEstimate(flops=flops,
                                      transcendentals=transcendentals,
                                      bytes_accessed=bytes_accessed),
    )(xp, params["w_wide"], params["b_wide"], params["emb"],
      params["w1"], params["b1"], params["w2"], params["b2"])

    return out[:B]


# ---------------------------------------------------------------------------
# Deterministic parameter init (weights stored pre-transposed: (in, out)).
# ---------------------------------------------------------------------------
def init_params(key, embedding_dim, hidden_dim):
    ks = jax.random.split(key, 8)

    def lin_w(k, fan_in, fan_out):
        return jax.random.normal(k, (fan_in, fan_out), jnp.float32) / jnp.sqrt(fan_in)

    return {
        "w_wide": lin_w(ks[0], NUM_WIDE, embedding_dim),
        "b_wide": 0.01 * jax.random.normal(ks[1], (1, embedding_dim), jnp.float32),
        "emb": jax.random.normal(ks[2], (NUM_CAT, hidden_dim), jnp.float32),
        "w1": lin_w(ks[3], hidden_dim, embedding_dim),
        "b1": 0.01 * jax.random.normal(ks[4], (1, embedding_dim), jnp.float32),
        "w2": lin_w(ks[5], embedding_dim, embedding_dim),
        "b2": 0.01 * jax.random.normal(ks[6], (1, embedding_dim), jnp.float32),
    }


# Pure-JAX reference of the PyTorch forward (for correctness check).
def metar_block_ref(params, x):
    wide = x[:, :NUM_WIDE] @ params["w_wide"] + params["b_wide"][0]
    cat = x[:, NUM_WIDE].astype(jnp.int32)
    cat_emb = params["emb"][cat]
    h = cat_emb @ params["w1"] + params["b1"][0]
    h = h * jax.nn.sigmoid(h)                         # nonlinearity(default='swish')
    deep = h @ params["w2"] + params["b2"][0]
    return wide + deep


if __name__ == "__main__":
    # small shapes: batch=2, 13 wide features + 1 categorical, embedding_dim=hidden_dim=32
    B, E, H = 2, 32, 32

    key = jax.random.PRNGKey(0)
    kp, kx, kc = jax.random.split(key, 3)
    params = init_params(kp, E, H)

    x_wide = jax.random.normal(kx, (B, NUM_WIDE), jnp.float32)
    x_cat = jax.random.randint(kc, (B, 1), 0, NUM_CAT).astype(jnp.float32)
    x = jnp.concatenate([x_wide, x_cat], axis=1)      # (B, 14)

    fwd = jax.jit(functools.partial(metar_block_forward))
    out = jax.block_until_ready(fwd(params, x))

    ref = metar_block_ref(params, x)
    assert out.shape == (B, E), out.shape
    assert bool(jnp.all(jnp.isfinite(out)))
    assert bool(jnp.allclose(out, ref, rtol=1e-5, atol=1e-5)), \
        float(jnp.max(jnp.abs(out - ref)))
    print("KERNEL_OK")
</pallas_src>

<mosaic_0001>
module attributes {stable_mosaic.version = 11 : i64} {
  func.func @_metar_kernel(%arg0: i32, %arg1: memref<2x14xf32, #tpu.memory_space<vmem>>, %arg2: memref<13x32xf32, #tpu.memory_space<vmem>>, %arg3: memref<1x32xf32, #tpu.memory_space<vmem>>, %arg4: memref<7x32xf32, #tpu.memory_space<vmem>>, %arg5: memref<32x32xf32, #tpu.memory_space<vmem>>, %arg6: memref<1x32xf32, #tpu.memory_space<vmem>>, %arg7: memref<32x32xf32, #tpu.memory_space<vmem>>, %arg8: memref<1x32xf32, #tpu.memory_space<vmem>>, %arg9: memref<2x32xf32, #tpu.memory_space<vmem>>) attributes {dimension_semantics = [#tpu.dimension_semantics<parallel>], iteration_bounds = array<i64: 1>, scalar_prefetch = 0 : i64, scratch_operands = 0 : i64, tpu.core_type = #tpu.core_type<tc>, window_params = [{transform_indices = @transform_0, window_bounds = array<i64: 2, 14>}, {pipeline_mode = #tpu.pipeline_mode<synchronous>, transform_indices = @transform_1, window_bounds = array<i64: 13, 32>}, {pipeline_mode = #tpu.pipeline_mode<synchronous>, transform_indices = @transform_2, window_bounds = array<i64: 1, 32>}, {pipeline_mode = #tpu.pipeline_mode<synchronous>, transform_indices = @transform_3, window_bounds = array<i64: 7, 32>}, {pipeline_mode = #tpu.pipeline_mode<synchronous>, transform_indices = @transform_4, window_bounds = array<i64: 32, 32>}, {pipeline_mode = #tpu.pipeline_mode<synchronous>, transform_indices = @transform_5, window_bounds = array<i64: 1, 32>}, {pipeline_mode = #tpu.pipeline_mode<synchronous>, transform_indices = @transform_6, window_bounds = array<i64: 32, 32>}, {pipeline_mode = #tpu.pipeline_mode<synchronous>, transform_indices = @transform_7, window_bounds = array<i64: 1, 32>}, {transform_indices = @transform_8, window_bounds = array<i64: 2, 32>}]} {
    %c0 = arith.constant 0 : index
    %c0_0 = arith.constant 0 : index
    %0 = vector.load %arg1[%c0, %c0_0] : memref<2x14xf32, #tpu.memory_space<vmem>>, vector<2x14xf32>
    %1 = vector.extract_strided_slice %0 {offsets = [0, 0], sizes = [2, 13], strides = [1, 1]} : vector<2x14xf32> to vector<2x13xf32>
    %c0_1 = arith.constant 0 : index
    %c0_2 = arith.constant 0 : index
    %2 = vector.load %arg2[%c0_1, %c0_2] : memref<13x32xf32, #tpu.memory_space<vmem>>, vector<13x32xf32>
    %cst = arith.constant dense<0.000000e+00> : vector<2x32xf32>
    %3 = tpu.matmul %1, %2, %cst {dimension_numbers = #tpu.dot_dimension_numbers<[1], [0], [0], [1], [0, 0, 1, 1], [], []>} : vector<2x13xf32>, vector<13x32xf32>, vector<2x32xf32> -> vector<2x32xf32>
    %c0_3 = arith.constant 0 : index
    %c0_4 = arith.constant 0 : index
    %4 = vector.load %arg3[%c0_3, %c0_4] : memref<1x32xf32, #tpu.memory_space<vmem>>, vector<1x32xf32>
    %5 = vector.broadcast %4 : vector<1x32xf32> to vector<2x32xf32>
    %6 = arith.addf %3, %5 : vector<2x32xf32>
    %7 = vector.extract_strided_slice %0 {offsets = [0, 13], sizes = [2, 1], strides = [1, 1]} : vector<2x14xf32> to vector<2x1xf32>
    %8 = arith.fptosi %7 : vector<2x1xf32> to vector<2x1xi32>
    %9 = tpu.iota {dimensions = array<i32: 1>} : vector<2x7xi32>
    %10 = vector.broadcast %8 : vector<2x1xi32> to vector<2x7xi32>
    %11 = arith.cmpi eq, %9, %10 : vector<2x7xi32>
    %12 = arith.extui %11 : vector<2x7xi1> to vector<2x7xi32>
    %13 = arith.sitofp %12 : vector<2x7xi32> to vector<2x7xf32>
    %c0_5 = arith.constant 0 : index
    %c0_6 = arith.constant 0 : index
    %14 = vector.load %arg4[%c0_5, %c0_6] : memref<7x32xf32, #tpu.memory_space<vmem>>, vector<7x32xf32>
    %cst_7 = arith.constant dense<0.000000e+00> : vector<2x32xf32>
    %15 = tpu.matmul %13, %14, %cst_7 {dimension_numbers = #tpu.dot_dimension_numbers<[1], [0], [0], [1], [0, 0, 1, 1], [], []>} : vector<2x7xf32>, vector<7x32xf32>, vector<2x32xf32> -> vector<2x32xf32>
    %c0_8 = arith.constant 0 : index
    %c0_9 = arith.constant 0 : index
    %16 = vector.load %arg5[%c0_8, %c0_9] : memref<32x32xf32, #tpu.memory_space<vmem>>, vector<32x32xf32>
    %cst_10 = arith.constant dense<0.000000e+00> : vector<2x32xf32>
    %17 = tpu.matmul %15, %16, %cst_10 {dimension_numbers = #tpu.dot_dimension_numbers<[1], [0], [0], [1], [0, 0, 1, 1], [], []>} : vector<2x32xf32>, vector<32x32xf32>, vector<2x32xf32> -> vector<2x32xf32>
    %c0_11 = arith.constant 0 : index
    %c0_12 = arith.constant 0 : index
    %18 = vector.load %arg6[%c0_11, %c0_12] : memref<1x32xf32, #tpu.memory_space<vmem>>, vector<1x32xf32>
    %19 = vector.broadcast %18 : vector<1x32xf32> to vector<2x32xf32>
    %20 = arith.addf %17, %19 : vector<2x32xf32>
    %21 = arith.negf %20 : vector<2x32xf32>
    %22 = math.exp %21 : vector<2x32xf32>
    %cst_13 = arith.constant 1.000000e+00 : f32
    %23 = vector.broadcast %cst_13 : f32 to vector<2x32xf32>
    %24 = arith.addf %23, %22 : vector<2x32xf32>
    %25 = arith.divf %23, %24 : vector<2x32xf32>
    %26 = arith.mulf %20, %25 : vector<2x32xf32>
    %c0_14 = arith.constant 0 : index
    %c0_15 = arith.constant 0 : index
    %27 = vector.load %arg7[%c0_14, %c0_15] : memref<32x32xf32, #tpu.memory_space<vmem>>, vector<32x32xf32>
    %cst_16 = arith.constant dense<0.000000e+00> : vector<2x32xf32>
    %28 = tpu.matmul %26, %27, %cst_16 {dimension_numbers = #tpu.dot_dimension_numbers<[1], [0], [0], [1], [0, 0, 1, 1], [], []>} : vector<2x32xf32>, vector<32x32xf32>, vector<2x32xf32> -> vector<2x32xf32>
    %c0_17 = arith.constant 0 : index
    %c0_18 = arith.constant 0 : index
    %29 = vector.load %arg8[%c0_17, %c0_18] : memref<1x32xf32, #tpu.memory_space<vmem>>, vector<1x32xf32>
    %30 = vector.broadcast %29 : vector<1x32xf32> to vector<2x32xf32>
    %31 = arith.addf %28, %30 : vector<2x32xf32>
    %32 = arith.addf %6, %31 : vector<2x32xf32>
    %c0_19 = arith.constant 0 : index
    %c0_20 = arith.constant 0 : index
    %33 = vector.load %arg9[%c0_19, %c0_20] : memref<2x32xf32, #tpu.memory_space<vmem>>, vector<2x32xf32>
    tpu.vector_store %arg9[%c0_19, %c0_20], %32 {strides = array<i32>} : memref<2x32xf32, #tpu.memory_space<vmem>>, vector<2x32xf32>,
    return
  }
  func.func @transform_0(%arg0: i32) -> (i32, i32) {
    %c0_i32 = arith.constant 0 : i32
    %c0_i32_0 = arith.constant 0 : i32
    return %arg0, %c0_i32 : i32, i32
  }
  func.func @transform_1(%arg0: i32) -> (i32, i32) {
    %c0_i32 = arith.constant 0 : i32
    %c0_i32_0 = arith.constant 0 : i32
    %c0_i32_1 = arith.constant 0 : i32
    return %c0_i32, %c0_i32_0 : i32, i32
  }
  func.func @transform_2(%arg0: i32) -> (i32, i32) {
    %c0_i32 = arith.constant 0 : i32
    %c0_i32_0 = arith.constant 0 : i32
    %c0_i32_1 = arith.constant 0 : i32
    return %c0_i32, %c0_i32_0 : i32, i32
  }
  func.func @transform_3(%arg0: i32) -> (i32, i32) {
    %c0_i32 = arith.constant 0 : i32
    %c0_i32_0 = arith.constant 0 : i32
    %c0_i32_1 = arith.constant 0 : i32
    return %c0_i32, %c0_i32_0 : i32, i32
  }
  func.func @transform_4(%arg0: i32) -> (i32, i32) {
    %c0_i32 = arith.constant 0 : i32
    %c0_i32_0 = arith.constant 0 : i32
    %c0_i32_1 = arith.constant 0 : i32
    return %c0_i32, %c0_i32_0 : i32, i32
  }
  func.func @transform_5(%arg0: i32) -> (i32, i32) {
    %c0_i32 = arith.constant 0 : i32
    %c0_i32_0 = arith.constant 0 : i32
    %c0_i32_1 = arith.constant 0 : i32
    return %c0_i32, %c0_i32_0 : i32, i32
  }
  func.func @transform_6(%arg0: i32) -> (i32, i32) {
    %c0_i32 = arith.constant 0 : i32
    %c0_i32_0 = arith.constant 0 : i32
    %c0_i32_1 = arith.constant 0 : i32
    return %c0_i32, %c0_i32_0 : i32, i32
  }
  func.func @transform_7(%arg0: i32) -> (i32, i32) {
    %c0_i32 = arith.constant 0 : i32
    %c0_i32_0 = arith.constant 0 : i32
    %c0_i32_1 = arith.constant 0 : i32
    return %c0_i32, %c0_i32_0 : i32, i32
  }
  func.func @transform_8(%arg0: i32) -> (i32, i32) {
    %c0_i32 = arith.constant 0 : i32
    %c0_i32_0 = arith.constant 0 : i32
    return %arg0, %c0_i32 : i32, i32
  }
}

</mosaic_0001>

<bundles_post_ra>
// kernel: metar_block_forward.1
= control target key start
LH: loop header
LB: loop body
LE: loop exit
PB: predicated region body
PF: predicated region fallthrough
CT: control target
= control target key end

     0   :  { %13 = vsyncpa [#allocation3], 0  ;;  %s798_s0 = inlined_call_operand.vmem [shape: f32[2,14], index: 0, kind: input, shape index: {}]   ;;  %s799_s1 = inlined_call_operand.hbm [shape: f32[13,32], index: 1, kind: input, shape index: {}]   ;;  %s800_s2 = inlined_call_operand.vmem [shape: f32[1,32], index: 2, kind: input, shape index: {}]   ;;  %s801_s3 = inlined_call_operand.hbm [shape: f32[7,32], index: 3, kind: input, shape index: {}]   ;;  %s802_s4 = inlined_call_operand.hbm [shape: f32[32,32], index: 4, kind: input, shape index: {}]   ;;  %s803_s5 = inlined_call_operand.hbm [shape: f32[1,32], index: 5, kind: input, shape index: {}]   ;;  %s804_s6 = inlined_call_operand.hbm [shape: f32[32,32], index: 6, kind: input, shape index: {}]   ;;  %s805_s7 = inlined_call_operand.hbm [shape: f32[1,32], index: 7, kind: input, shape index: {}]   ;;  %s806_s8 = inlined_call_operand.hbm [shape: f32[2,32], index: 8, kind: output, shape index: {}]  }
   0x1   :  { %14 = vsyncpa [#allocation6], 0 }
   0x2   :  { %15 = vsyncpa [#allocation9], 0 }
   0x3   :  { %16 = vsyncpa [#allocation12], 0 }
   0x4   :  { %17 = vsyncpa [#allocation4], 0  ;;  %s708_s27 = smov [#allocation5]   ;;  %s709_s29 = smov [#allocation8]  }
   0x5   :  { %s40_s28 = sshll.u32 %s708_s27, 4  ;;  %s62_s30 = sshll.u32 %s709_s29, 4  ;;  %s41_s28 = int_to_ptr.vmem [resolvable:$true] %s40_s28  ;;  %s63_s30 = int_to_ptr.vmem [resolvable:$true] %s62_s30 }
   0x6   :  { %s566_s9 = scalar_lea.vmem %s41_s28, 128  ;;  %p571_p1 = scmp.lt.s32.totalorder %s41_s28, %s41_s28 }
   0x7   :  { %p567_p0 = scmp.ne.s32.totalorder %s41_s28, %s566_s9  ;;  %p572_p2 = scmp.lt.s32.totalorder %s566_s9, %s566_s9 }
   0x9   :  { %p573_p3 = por %p572_p2, %p571_p1 }
   0xb   :  { %p574_p4 = pnand %p573_p3, %p567_p0 }
   0xd   :  { %577 = shalt.err (!%p574_p4)
}
   0xe   :  { %43 = dma.hbm_to_vmem [thread:$0]  %s801_s3, 128, %s41_s28, [#allocation6]  }
   0xf   :  { %s586_s12 = scalar_lea.vmem %s63_s30, 16  ;;  %s590_s13 = scalar_lea.vmem %s63_s30, 32 }
  0x10   :  { %p587_p5 = scmp.ne.s32.totalorder %s63_s30, %s586_s12  ;;  %p591_p6 = scmp.lt.s32.totalorder %s63_s30, %s63_s30 }
  0x11   :  { %p592_p7 = scmp.lt.s32.totalorder %s590_s13, %s586_s12 }
  0x13   :  { %p593_p8 = por %p592_p7, %p591_p6 }
  0x15   :  { %p594_p9 = pnand %p593_p8, %p587_p5 }
  0x17   :  { %597 = shalt.err (!%p594_p9)
}
  0x18   :  { %65 = dma.hbm_to_vmem [thread:$0]  %s803_s5, 16, %s63_s30, [#allocation9]  }
  0x19   :  { %s710_s16 = smov [#allocation2]  }
  0x1a   :  { %s25_s17 = sshll.u32 %s710_s16, 4  ;;  %s26_s17 = int_to_ptr.vmem [resolvable:$true] %s25_s17 }
  0x1b   :  { %s606_s18 = scalar_lea.vmem %s26_s17, 256  ;;  %p611_p11 = scmp.lt.s32.totalorder %s26_s17, %s26_s17 }
  0x1c   :  { %p607_p10 = scmp.ne.s32.totalorder %s26_s17, %s606_s18  ;;  %p612_p12 = scmp.lt.s32.totalorder %s606_s18, %s606_s18 }
  0x1e   :  { %p613_p13 = por %p612_p12, %p611_p11 }
  0x20   :  { %p614_p0 = pnand %p613_p13, %p607_p10 }
  0x22   :  { %617 = shalt.err (!%p614_p0)
}
  0x23   :  { %s711_s3 = smov 128   ;;  %s712_s19 = smov 8  }
  0x24   :  { %31 = dma.hbm_to_vmem [thread:$0]  %s799_s1, 256, %s26_s17, [#allocation3], %s711_s3, %s711_s3, %s712_s19  }
  0x25   :  { %s713_s22 = smov [#allocation7]   ;;  %s714_s5 = smov [#allocation10]  }
  0x26   :  { %s49_s23 = sshll.u32 %s713_s22, 4  ;;  %s71_s24 = sshll.u32 %s714_s5, 4  ;;  %s50_s23 = int_to_ptr.vmem [resolvable:$true] %s49_s23  ;;  %s72_s24 = int_to_ptr.vmem [resolvable:$true] %s71_s24 }
  0x27   :  { %s626_s25 = scalar_lea.vmem %s50_s23, 512  ;;  %p631_p2 = scmp.lt.s32.totalorder %s50_s23, %s50_s23 }
  0x28   :  { %p627_p1 = scmp.ne.s32.totalorder %s50_s23, %s626_s25  ;;  %p632_p3 = scmp.lt.s32.totalorder %s626_s25, %s626_s25 }
  0x2a   :  { %p633_p4 = por %p632_p3, %p631_p2 }
  0x2c   :  { %p634_p5 = pnand %p633_p4, %p627_p1 }
  0x2e   :  { %637 = shalt.err (!%p634_p5)
}
  0x2f   :  { %55 = dma.hbm_to_vmem [thread:$0]  %s802_s4, 512, %s50_s23, [#allocation6], %s711_s3, %s711_s3, %s712_s19  }
  0x30   :  { %s646_s28 = scalar_lea.vmem %s72_s24, 512  ;;  %p651_p7 = scmp.lt.s32.totalorder %s72_s24, %s72_s24 }
  0x31   :  { %p647_p6 = scmp.ne.s32.totalorder %s72_s24, %s646_s28  ;;  %p652_p8 = scmp.lt.s32.totalorder %s646_s28, %s646_s28 }
  0x33   :  { %p653_p9 = por %p652_p8, %p651_p7 }
  0x35   :  { %p654_p10 = pnand %p653_p9, %p647_p6 }
  0x37   :  { %657 = shalt.err (!%p654_p10)
}
  0x38   :  { %77 = dma.hbm_to_vmem [thread:$0]  %s804_s6, 512, %s72_s24, [#allocation9], %s711_s3, %s711_s3, %s712_s19  }
  0x39   :  { %s715_s30 = smov [#allocation11]  }
  0x3a   :  { %s84_s9 = sshll.u32 %s715_s30, 4  ;;  %s85_s9 = int_to_ptr.vmem [resolvable:$true] %s84_s9 }
  0x3b   :  { %s666_s10 = scalar_lea.vmem %s85_s9, 16  ;;  %s670_s11 = scalar_lea.vmem %s85_s9, 32 }
  0x3c   :  { %p667_p11 = scmp.ne.s32.totalorder %s85_s9, %s666_s10  ;;  %p671_p12 = scmp.lt.s32.totalorder %s85_s9, %s85_s9 }
  0x3d   :  { %p672_p13 = scmp.lt.s32.totalorder %s670_s11, %s666_s10 }
  0x3f   :  { %p673_p0 = por %p672_p13, %p671_p12 }
  0x41   :  { %p674_p1 = pnand %p673_p0, %p667_p11 }
  0x43   :  { %677 = shalt.err (!%p674_p1)
}
  0x44   :  { %87 = dma.hbm_to_vmem [thread:$0]  %s805_s7, 16, %s85_s9, [#allocation12]  }
  0x45   :  { %698 = dma.done.wait [#allocation3], 256  }
  0x46   :  { %699 = vsyncadd [#allocation3], 4294967040 }
  0x47   :  { %700 = dma.done.wait [#allocation6], 640  }
  0x48   :  { %701 = vsyncadd [#allocation6], 4294966656 }
  0x49   :  { %702 = dma.done.wait [#allocation9], 528  }
  0x4a   :  { %703 = vsyncadd [#allocation9], 4294966768 }
  0x4b   :  { %704 = dma.done.wait [#allocation12], 16  }
  0x4c   :  { %705 = vsyncadd [#allocation12], 4294967280  ;;  %v716_v0 = vmov 13   ;;  %v717_v1 = vmov 0.0   ;;  %v106_v2 = vld [vmem:[%s798_s0] sm:$0x3]  ;;  %v195_v6 = vlaneseq }
  0x4d   :  { %553 = vset.pattern.permute.xlu0 %v716_v0  ;;  %512 = vmatprep.subr.mxu1 %v717_v1  ;;  %v539_v3 = vtrunc.f32 %v106_v2  ;;  %v203_v4 = vld [vmem:[#allocation5] sm:$0x7f]  ;;  %vm208_vm0 = vcmask 1046528   ;;  %vm718_vm1 = vmmov 0   ;;  %vm204_vm2 = vcmask 56320   ;;  %v284_v11 = vld [vmem:[#allocation7 + $0x10] sm:$0xff] }
  0x4e   :  { %505 = vmatprep.subr.mxu0 %v717_v1  ;;  %513 = vmatpush3.msk.msra.mxu1 %vm208_vm0, %v203_v4  ;;  %v196_v7 = vand.u32 127, %v195_v6  ;;  %v285_v9 = vld [vmem:[#allocation7 + $0x18] sm:$0xff]  ;;  %v283_v12 = vld [vmem:[#allocation7 + $0x8] sm:$0xff]  ;;  %v282_v13 = vld [vmem:[#allocation7] sm:$0xff]  ;;  %vm293_vm4 = vcmask 261120   ;;  %vm120_vm5 = vcmask 1044480  }
  0x4f   :  { %514 = vmatprep.mubr.msk.f32.mxu1 %vm718_vm1, %v717_v1  ;;  %v540_v5 = vcvt.f32.s32 %v539_v3  ;;  %517 = vmatprep.subr.mxu1 %v717_v1  ;;  %v108_v16 = vld [vmem:[#allocation2 + $0x8] sm:$0x1f]  ;;  %v107_v17 = vld [vmem:[#allocation2] sm:$0xff]  ;;  %vm116_vm6 = vcmask 105472   ;;  %v377_v18 = vld [vmem:[#allocation10 + $0x18] sm:$0xff]  ;;  %s719_s14 = smov [#allocation13]  }
  0x50   :  { %509 = vmatprep.mubr.msk.f32.mxu0 %vm718_vm1, %v717_v1  ;;  %506 = vmatpush3.msk.msra.mxu0 %vm120_vm5, %v108_v16  ;;  %v376_v19 = vld [vmem:[#allocation10 + $0x10] sm:$0xff]  ;;  %v375_v20 = vld [vmem:[#allocation10 + $0x8] sm:$0xff]  ;;  %v374_v21 = vld [vmem:[#allocation10] sm:$0xff]  ;;  %s467_s15 = sshll.u32 %s719_s14, 4  ;;  %vm459_vm7 = vcmask 254976   ;;  %s468_s15 = int_to_ptr.vmem [resolvable:$true] %s467_s15 }
  0x51   :  { %198 = vperm.xlu0 %553, %v540_v5   ;;  %507 = vmatprep.subr.mxu0 %v717_v1  ;;  %v485_v22 = vld [vmem:[#allocation8] ss:$0 sm:$0xff]  ;;  %v479_v33 = vld [vmem:[%s800_s2] ss:$0 sm:$0xff]  ;;  %v488_v34 = vld [vmem:[#allocation11] ss:$0 sm:$0xff]  ;;  %p683_p3 = scmp.lt.s32.totalorder %s468_s15, %s468_s15 }
  0x52   :  { %508 = vmatpush3.msra.mxu0 %v107_v17  ;;  %s678_s16 = scalar_lea.vmem %s468_s15, 32 }
  0x53   :  { %510 = vmatmul.mubr.msk.f32.vlgmr.msra.gmra.mxu0 %vm116_vm6, %v106_v2  ;;  %528 = vmatprep.subr.mxu0 %v717_v1  ;;  %p679_p2 = scmp.ne.s32.totalorder %s468_s15, %s678_s16  ;;  %p684_p4 = scmp.lt.s32.totalorder %s678_s16, %s678_s16 }
  0x54   :  { %536 = vmatprep.mubr.msk.f32.mxu0 %vm718_vm1, %v717_v1  ;;  %529 = vmatpush3.msra.mxu0 %v377_v18 }
  0x55   :  { %530 = vmatprep.subr.mxu0 %v717_v1  ;;  %p685_p5 = por %p684_p4, %p683_p3 }
  0x56   :  { %531 = vmatpush3.msra.mxu0 %v376_v19 }
  0x57   :  { %532 = vmatprep.subr.mxu0 %v717_v1  ;;  %p686_p6 = pnand %p685_p5, %p679_p2 }
  0x58   :  { %533 = vmatpush3.msra.mxu0 %v375_v20 }
  0x59   :  { %534 = vmatprep.subr.mxu0 %v717_v1 }
  0x5a   :  { %535 = vmatpush3.msra.mxu0 %v374_v21 }
  0xcc   :  { %v199_v8 = vpop.permute.xlu0 %198 }
  0xcd   :  { %vm200_vm3 = vcmp.eq.s32.totalorder %v196_v7, %v199_v8 }
  0xce   :  { %v482_v10 = vsel %vm200_vm3, 1.0, %v717_v1 }
  0xcf   :  { %515 = vmatmul.mubr.msk.f32.vlgmr.msra.gmra.mxu1 %vm204_vm2, %v482_v10 }
  0xd0   :  { %518 = vmatpush3.msra.mxu1 %v285_v9  ;;  %525 = vmatprep.mubr.msk.f32.mxu1 %vm718_vm1, %v717_v1 }
  0xd1   :  { %519 = vmatprep.subr.mxu1 %v717_v1 }
  0xd2   :  { %520 = vmatpush3.msra.mxu1 %v284_v11 }
  0xd3   :  { %521 = vmatprep.subr.mxu1 %v717_v1 }
  0xd4   :  { %522 = vmatpush3.msra.mxu1 %v283_v12 }
  0xd5   :  { %523 = vmatprep.subr.mxu1 %v717_v1 }
  0xd6   :  { %524 = vmatpush3.msra.mxu1 %v282_v13 }
 0x113   :  { %v190_v31 = vpop.f32.mrf.mxu0 }
 0x114   :  { %v191_v36 = vadd.f32 %v479_v33, %v190_v31 }
 0x115   :  { %v511_v32 = vpop.f32.mrf.mxu0 }
 0x18f   :  { %v278_v14 = vpop.f32.mrf.mxu1 }
 0x190   :  { %526 = vmatmul.mubr.msk.f32.vlgmr.msra.gmra.mxu1 %vm293_vm4, %v278_v14 }
 0x191   :  { %v516_v15 = vpop.f32.mrf.mxu1 }
 0x250   :  { %v363_v23 = vpop.f32.mrf.mxu1 }
 0x251   :  { %v364_v24 = vadd.f32 %v485_v22, %v363_v23 }
 0x252   :  { %v527_v25 = vpop.f32.mrf.mxu1 }
 0x253   :  { %v487_v26 = vmul.f32 -1.442695, %v364_v24 }
 0x255   :  { %554 = vpow2.f32 %v487_v26 }
 0x262   :  { %v555_v27 = vpop.eup %554 }
 0x263   :  { %v370_v28 = vadd.f32 1.0, %v555_v27 }
 0x265   :  { %556 = vrcp.f32 %v370_v28 }
 0x272   :  { %v557_v29 = vpop.eup %556 }
 0x273   :  { %v373_v30 = vmul.f32 %v557_v29, %v364_v24 }
 0x275   :  { %537 = vmatmul.mubr.msk.f32.vlgmr.msra.gmra.mxu0 %vm293_vm4, %v373_v30 }
 0x335   :  { %v454_v35 = vpop.f32.mrf.mxu0 }
 0x336   :  { %v455_v37 = vadd.f32 %v488_v34, %v454_v35 }
 0x337   :  { %v538_v38 = vpop.f32.mrf.mxu0 }
 0x338   :  { %v458_v39 = vadd.f32 %v455_v37, %v191_v36 }
 0x33a   :  { %460 = vst.msk [vmem:[#allocation13] sm:$0x3] %vm459_vm7, %v458_v39 }
 0x33b   :  { %689 = shalt.err (!%p686_p6)
}
 0x33c   :  { %470 = dma.vmem_to_hbm [thread:$0]  %s468_s15, 32, %s806_s8, [#allocation4]  }
 0x33d   :  { %706 = dma.done.wait [#allocation4], 32  }
 0x33e   :  { %707 = vsyncadd [#allocation4], 4294967264 }
 0x33f   :  { %474 = vsyncpa [#allocation3], 1 }
 0x340   :  { %475 = vsyncpa [#allocation6], 1 }
 0x341   :  { %476 = vsyncpa [#allocation9], 1 }
 0x342   :  { %477 = vsyncpa [#allocation12], 1 }
 0x343   :  { %478 = vsyncpa [#allocation4], 1 }

</bundles_post_ra>
